<compile_context>
chip_gen: v7x
topology: tpu7x:2x2x1
jax: 0.10.0
libtpu: 0.0.40
codegen_flags: <defaults>
</compile_context>

<pallas_src>
import functools

import jax
import jax.numpy as jnp
from jax.experimental import pallas as pl
from jax.experimental.pallas import tpu as pltpu

_LANE = 128
_SUBLANE = 8
# Per-step VMEM working set (all double-buffered blocks + scratch). Kept well under
# v7x's 64 MiB physical / 32 MiB scoped-default VMEM; generous on v5e/v6e (128 MiB).
_VMEM_BUDGET = 20 * 1024 * 1024


def _round_up(x, m):
    return ((x + m - 1) // m) * m


def _pad_to(a, shape):
    pads = [(0, t - s) for s, t in zip(a.shape, shape)]
    if any(p[1] for p in pads):
        a = jnp.pad(a, pads)
    return a


def _pick_tile(n, candidates, max_pad=0.125, min_big=64):
    """Tile for a dim of extent n: prefer a large exact divisor (no pad, few steps),
    then the largest candidate with <=12.5% round-up padding, then any exact divisor.
    Avoids both padding blow-ups and a sea of tiny grid steps. Returns (tile, padded_n)."""
    cands = sorted({c for c in candidates if c <= n}, reverse=True) or [min(candidates)]
    for t in cands:
        if t >= min_big and n % t == 0:
            return t, n
    for t in cands:
        p = _round_up(n, t)
        if p - n <= max_pad * n:
            return t, p
    for t in cands:
        if n % t == 0:
            return t, n
    t = cands[-1]
    return t, _round_up(n, t)


def _largest_div128(n, cap):
    """Largest multiple of 128 that divides n (n is a multiple of 128) and is <= cap."""
    best, t = _LANE, _LANE
    while t <= min(n, cap):
        if n % t == 0:
            best = t
        t += _LANE
    return best


def _vmem_limit(est_bytes):
    return int(min(max(2 * est_bytes, 32 * 1024 * 1024), 48 * 1024 * 1024))


# ---------------------------------------------------------------------------
# Shared head:  y[M, tw] = z[M, nf] @ wt[nf, tw] + b[tw]     (wt = W.T, built once)
# ---------------------------------------------------------------------------
def _shared_kernel_resident(z_ref, w_ref, b_ref, o_ref):
    # Whole [nf, twp] weight is VMEM-resident: one plain MXU dot per M tile,
    # no reduction grid axis, no accumulator scratch, no pl.when.
    acc = jnp.dot(z_ref[...], w_ref[...], preferred_element_type=jnp.float32)
    o_ref[...] = (acc + b_ref[...].astype(jnp.float32)).astype(o_ref.dtype)


def _shared_kernel_ktiled(z_ref, w_ref, b_ref, o_ref, acc_ref):
    k = pl.program_id(2)

    @pl.when(k == 0)
    def _init():
        # Seed the accumulator with the bias -> epilogue is just cast + store.
        acc_ref[...] = jnp.broadcast_to(b_ref[...].astype(jnp.float32), acc_ref.shape)

    acc_ref[...] += jnp.dot(z_ref[...], w_ref[...], preferred_element_type=jnp.float32)

    @pl.when(k == pl.num_programs(2) - 1)
    def _finalize():
        o_ref[...] = acc_ref[...].astype(o_ref.dtype)


@jax.jit
def flatten_head_shared(x, w, b):
    """x: [B, n_vars, d_model, patch_num], w: [tw, nf], b: [tw] -> [B, n_vars, tw]."""
    B, n_vars, d_model, patch_num = x.shape
    nf = d_model * patch_num
    tw = w.shape[0]
    M = B * n_vars

    twp = _round_up(tw, _LANE)                 # lane-dense (unmasked) output stores
    # Pre-transpose the (static) weight once -> plain [M,K]@[K,N] dot in the kernel.
    # In production this transform would be done once outside the hot path.
    wt = _pad_to(w.T, (nf, twp))               # [nf, twp]
    bp = _pad_to(b.reshape(1, tw), (1, twp))
    z = x.reshape(M, nf)                       # Flatten(start_dim=-2); view, no copy

    m8 = _round_up(M, _SUBLANE)
    w_bytes = 4 * 2 * (nf * twp + twp)         # double-buffered weight + bias

    if w_bytes <= _VMEM_BUDGET // 2:
        # --- resident-weight path: weight lives in VMEM, grid over M only ------------
        per_row = 4 * 2 * (nf + twp)           # z block + out block, double-buffered
        cap = max(_SUBLANE, (_VMEM_BUDGET - w_bytes) // per_row)
        cands = tuple(t for t in (512, 256, 128, 64, 32, 16, 8) if t <= cap) or (8,)
        tm, Mp = _pick_tile(m8, cands)
        if Mp // tm == 1 and Mp >= 16 and (Mp // 2) % _SUBLANE == 0:
            tm = Mp // 2                       # >=2 parallel steps -> v7x megacore split
        zp = _pad_to(z, (Mp, nf))              # no-op when 8 | M and tm | M (demo: no-op)
        est = w_bytes + per_row * tm
        out = pl.pallas_call(
            _shared_kernel_resident,
            out_shape=jax.ShapeDtypeStruct((Mp, twp), x.dtype),
            grid_spec=pltpu.PrefetchScalarGridSpec(
                num_scalar_prefetch=0,
                grid=(Mp // tm,),
                in_specs=[
                    pl.BlockSpec((tm, nf), lambda i: (i, 0)),
                    pl.BlockSpec((nf, twp), lambda i: (0, 0)),   # fetched once, stays
                    pl.BlockSpec((1, twp), lambda i: (0, 0)),
                ],
                out_specs=pl.BlockSpec((tm, twp), lambda i: (i, 0)),
            ),
            compiler_params=pltpu.CompilerParams(
                dimension_semantics=("parallel",),
                vmem_limit_bytes=_vmem_limit(est),
            ),
        )(zp, wt, bp)
    else:
        # --- fallback for very large weights: (M, N, K)-tiled GEMM -------------------
        nf128 = _round_up(nf, _LANE)
        tn = 256 if twp % 256 == 0 else _LANE
        tk = _largest_div128(nf128, max(_LANE, (_VMEM_BUDGET // 4) // (4 * 2 * tn)))
        cap = max(_SUBLANE, (_VMEM_BUDGET // 4) // (4 * 2 * tk))
        cands = tuple(t for t in (512, 256, 128, 64, 32, 16, 8) if t <= cap) or (8,)
        tm, Mp = _pick_tile(m8, cands)
        zp = _pad_to(z, (Mp, nf128))           # K padded only to the next lane multiple
        wtp = _pad_to(wt, (nf128, twp))
        est = 4 * (2 * tm * tk + 2 * tk * tn + 2 * tn + 3 * tm * tn)
        out = pl.pallas_call(
            _shared_kernel_ktiled,
            out_shape=jax.ShapeDtypeStruct((Mp, twp), x.dtype),
            grid_spec=pltpu.PrefetchScalarGridSpec(
                num_scalar_prefetch=0,
                grid=(Mp // tm, twp // tn, nf128 // tk),
                in_specs=[
                    pl.BlockSpec((tm, tk), lambda i, j, k: (i, k)),
                    pl.BlockSpec((tk, tn), lambda i, j, k: (k, j)),
                    pl.BlockSpec((1, tn), lambda i, j, k: (0, j)),
                ],
                out_specs=pl.BlockSpec((tm, tn), lambda i, j, k: (i, j)),
                scratch_shapes=[pltpu.VMEM((tm, tn), jnp.float32)],
            ),
            compiler_params=pltpu.CompilerParams(
                dimension_semantics=("parallel", "parallel", "arbitrary"),
                vmem_limit_bytes=_vmem_limit(est),
            ),
        )(zp, wtp, bp)
    return out[:M, :tw].reshape(B, n_vars, tw)


# ---------------------------------------------------------------------------
# Individual head:  y[v, b, :] = z[b, v, :] @ wt[v] + bias[v]     (wt[v] = W_v.T)
# Output produced as [n_vars, B, twp]: each per-variable result is one dense
# leading-dim store; the tiny [B, n_vars, tw] transpose happens on the small
# output in the wrapper (never on the activation).
# ---------------------------------------------------------------------------
def _indiv_kernel_resident(z_ref, w_ref, b_ref, o_ref, *, v_blk):
    for v in range(v_blk):                     # small static unroll over variables
        acc = jnp.dot(z_ref[:, v, :], w_ref[v], preferred_element_type=jnp.float32)
        o_ref[v] = (acc + b_ref[v].astype(jnp.float32)).astype(o_ref.dtype)


def _indiv_kernel_ktiled(z_ref, w_ref, b_ref, o_ref, acc_ref, *, v_blk):
    k = pl.program_id(2)

    @pl.when(k == 0)
    def _init():
        acc_ref[...] = jnp.broadcast_to(b_ref[...].astype(jnp.float32), acc_ref.shape)

    for v in range(v_blk):
        acc_ref[v] += jnp.dot(z_ref[:, v, :], w_ref[v], preferred_element_type=jnp.float32)

    @pl.when(k == pl.num_programs(2) - 1)
    def _finalize():
        o_ref[...] = acc_ref[...].astype(o_ref.dtype)


@jax.jit
def flatten_head_individual(x, w, b):
    """x: [B, n_vars, d_model, patch_num], w: [n_vars, tw, nf], b: [n_vars, tw]."""
    B, n_vars, d_model, patch_num = x.shape
    nf = d_model * patch_num
    tw = w.shape[1]

    twp = _round_up(tw, _LANE)
    wt = _pad_to(jnp.transpose(w, (0, 2, 1)), (n_vars, nf, twp))   # [n_vars, nf, twp]
    bp = _pad_to(b.reshape(n_vars, 1, tw), (n_vars, 1, twp))
    z = x.reshape(B, n_vars, nf)               # Flatten(start_dim=-2); view, no copy

    # Variable block sits on the second-minor dim of the z block: full extent when
    # small, otherwise a multiple of 8 ((8,128) rule).
    if n_vars <= 8:
        v_blk, nvp = n_vars, n_vars
    else:
        v_blk, nvp = 8, _round_up(n_vars, 8)
        z = _pad_to(z, (B, nvp, nf))
        wt = _pad_to(wt, (nvp, nf, twp))
        bp = _pad_to(bp, (nvp, 1, twp))

    w_bytes = 4 * 2 * v_blk * (nf * twp + twp)  # double-buffered block of weights + bias

    if w_bytes <= _VMEM_BUDGET // 2:
        # --- resident path: grid (vars, batch) with batch innermost => each variable's
        # weight is DMA'd from HBM exactly once (never re-streamed per batch tile).
        per_b = 4 * 2 * v_blk * (nf + twp)      # z + out block rows, double-buffered
        if per_b * B <= _VMEM_BUDGET - w_bytes:
            tb, Bp = B, B                       # single full-extent batch tile, no padding
        else:
            cap = max(_SUBLANE, (_VMEM_BUDGET - w_bytes) // per_b)
            cands = tuple(t for t in (256, 128, 64, 32, 16, 8) if t <= cap) or (_SUBLANE,)
            tb, Bp = _pick_tile(_round_up(B, _SUBLANE), cands)
        zp = _pad_to(z, (Bp, nvp, nf))
        est = w_bytes + per_b * tb
        out = pl.pallas_call(
            functools.partial(_indiv_kernel_resident, v_blk=v_blk),
            out_shape=jax.ShapeDtypeStruct((nvp, Bp, twp), x.dtype),
            grid_spec=pltpu.PrefetchScalarGridSpec(
                num_scalar_prefetch=0,
                grid=(nvp // v_blk, Bp // tb),
                in_specs=[
                    pl.BlockSpec((tb, v_blk, nf), lambda v, bi: (bi, v, 0)),
                    pl.BlockSpec((v_blk, nf, twp), lambda v, bi: (v, 0, 0)),
                    pl.BlockSpec((v_blk, 1, twp), lambda v, bi: (v, 0, 0)),
                ],
                out_specs=pl.BlockSpec((v_blk, tb, twp), lambda v, bi: (v, bi, 0)),
            ),
            compiler_params=pltpu.CompilerParams(
                dimension_semantics=("parallel", "parallel"),
                vmem_limit_bytes=_vmem_limit(est),
            ),
        )(zp, wt, bp)
    else:
        # --- fallback for very large nf*tw: K-tiled, tk an exact divisor of nf128 -----
        nf128 = _round_up(nf, _LANE)
        tk = _largest_div128(
            nf128, max(_LANE, (_VMEM_BUDGET // 3) // (4 * 2 * v_blk * twp)))
        wk_bytes = 4 * 2 * v_blk * tk * twp
        per_b = 4 * v_blk * (2 * tk + 3 * twp)  # z + out (dbl-buffered) + f32 acc rows
        if per_b * B <= _VMEM_BUDGET - wk_bytes:
            tb, Bp = B, B
        else:
            cap = max(_SUBLANE, (_VMEM_BUDGET - wk_bytes) // per_b)
            cands = tuple(t for t in (256, 128, 64, 32, 16, 8) if t <= cap) or (_SUBLANE,)
            tb, Bp = _pick_tile(_round_up(B, _SUBLANE), cands)
        zp = _pad_to(z, (Bp, nvp, nf128))
        wtp = _pad_to(wt, (nvp, nf128, twp))
        est = wk_bytes + per_b * tb
        out = pl.pallas_call(
            functools.partial(_indiv_kernel_ktiled, v_blk=v_blk),
            out_shape=jax.ShapeDtypeStruct((nvp, Bp, twp), x.dtype),
            grid_spec=pltpu.PrefetchScalarGridSpec(
                num_scalar_prefetch=0,
                grid=(nvp // v_blk, Bp // tb, nf128 // tk),
                in_specs=[
                    pl.BlockSpec((tb, v_blk, tk), lambda v, bi, k: (bi, v, k)),
                    pl.BlockSpec((v_blk, tk, twp), lambda v, bi, k: (v, k, 0)),
                    pl.BlockSpec((v_blk, 1, twp), lambda v, bi, k: (v, 0, 0)),
                ],
                out_specs=pl.BlockSpec((v_blk, tb, twp), lambda v, bi, k: (v, bi, 0)),
                scratch_shapes=[pltpu.VMEM((v_blk, tb, twp), jnp.float32)],
            ),
            compiler_params=pltpu.CompilerParams(
                dimension_semantics=("parallel", "parallel", "arbitrary"),
                vmem_limit_bytes=_vmem_limit(est),
            ),
        )(zp, wtp, bp)
    # [nvp, Bp, twp] -> strip padding -> [B, n_vars, tw] (small-output transpose only).
    return out[:n_vars, :B, :tw].transpose(1, 0, 2)


# ---------------------------------------------------------------------------
# Main
# ---------------------------------------------------------------------------
if __name__ == "__main__":
    # Small shapes consistent with the module's forward:
    #   x: [bs, n_vars, d_model, patch_num], nf = d_model * patch_num.
    # nf=768 keeps the whole [nf, 128] weight VMEM-resident (no K axis, no K padding);
    # target_window=96 exercises lane padding to 128 + output slicing.
    B, n_vars, d_model, patch_num = 2, 4, 32, 24
    nf = d_model * patch_num          # 768
    target_window = 96

    key = jax.random.PRNGKey(0)
    kx, kw, kb, kwi, kbi = jax.random.split(key, 5)

    x = jax.random.normal(kx, (B, n_vars, d_model, patch_num), dtype=jnp.float32)

    # Deterministic "nn.Linear"-style parameters (synthetic, not loaded).
    w_shared = jax.random.normal(kw, (target_window, nf), dtype=jnp.float32) / jnp.sqrt(nf)
    b_shared = jax.random.normal(kb, (target_window,), dtype=jnp.float32) * 0.01
    w_indiv = jax.random.normal(kwi, (n_vars, target_window, nf), dtype=jnp.float32) / jnp.sqrt(nf)
    b_indiv = jax.random.normal(kbi, (n_vars, target_window), dtype=jnp.float32) * 0.01

    xflat = x.reshape(B, n_vars, nf)

    # --- shared (individual=False) path ---
    y_shared = jax.block_until_ready(flatten_head_shared(x, w_shared, b_shared))
    ref_shared = xflat @ w_shared.T + b_shared
    assert y_shared.shape == (B, n_vars, target_window)
    assert jnp.allclose(y_shared, ref_shared, atol=1e-3, rtol=1e-3), float(
        jnp.max(jnp.abs(y_shared - ref_shared))
    )

    # --- individual (individual=True) path ---
    y_indiv = jax.block_until_ready(flatten_head_individual(x, w_indiv, b_indiv))
    ref_indiv = jnp.einsum("bvf,vtf->bvt", xflat, w_indiv) + b_indiv[None]
    assert y_indiv.shape == (B, n_vars, target_window)
    assert jnp.allclose(y_indiv, ref_indiv, atol=1e-3, rtol=1e-3), float(
        jnp.max(jnp.abs(y_indiv - ref_indiv))
    )

    print("KERNEL_OK")
</pallas_src>

<mosaic_0001>
module attributes {stable_mosaic.version = 11 : i64} {
  func.func @_shared_kernel_resident(%arg0: i32, %arg1: memref<8x768xf32, #tpu.memory_space<vmem>>, %arg2: memref<768x128xf32, #tpu.memory_space<vmem>>, %arg3: memref<1x128xf32, #tpu.memory_space<vmem>>, %arg4: memref<8x128xf32, #tpu.memory_space<vmem>>) attributes {dimension_semantics = [#tpu.dimension_semantics<parallel>], iteration_bounds = array<i64: 1>, scalar_prefetch = 0 : i64, scratch_operands = 0 : i64, tpu.core_type = #tpu.core_type<tc>, window_params = [{transform_indices = @transform_0, window_bounds = array<i64: 8, 768>}, {pipeline_mode = #tpu.pipeline_mode<synchronous>, transform_indices = @transform_1, window_bounds = array<i64: 768, 128>}, {pipeline_mode = #tpu.pipeline_mode<synchronous>, transform_indices = @transform_2, window_bounds = array<i64: 1, 128>}, {transform_indices = @transform_3, window_bounds = array<i64: 8, 128>}]} {
    %c0 = arith.constant 0 : index
    %c0_0 = arith.constant 0 : index
    %0 = vector.load %arg1[%c0, %c0_0] : memref<8x768xf32, #tpu.memory_space<vmem>>, vector<8x768xf32>
    %c0_1 = arith.constant 0 : index
    %c0_2 = arith.constant 0 : index
    %1 = vector.load %arg2[%c0_1, %c0_2] : memref<768x128xf32, #tpu.memory_space<vmem>>, vector<768x128xf32>
    %cst = arith.constant dense<0.000000e+00> : vector<8x128xf32>
    %2 = tpu.matmul %0, %1, %cst {dimension_numbers = #tpu.dot_dimension_numbers<[1], [0], [0], [1], [0, 0, 1, 1], [], []>} : vector<8x768xf32>, vector<768x128xf32>, vector<8x128xf32> -> vector<8x128xf32>
    %c0_3 = arith.constant 0 : index
    %c0_4 = arith.constant 0 : index
    %3 = vector.load %arg3[%c0_3, %c0_4] : memref<1x128xf32, #tpu.memory_space<vmem>>, vector<1x128xf32>
    %4 = vector.broadcast %3 : vector<1x128xf32> to vector<8x128xf32>
    %5 = arith.addf %2, %4 : vector<8x128xf32>
    %c0_5 = arith.constant 0 : index
    %c0_6 = arith.constant 0 : index
    %6 = vector.load %arg4[%c0_5, %c0_6] : memref<8x128xf32, #tpu.memory_space<vmem>>, vector<8x128xf32>
    tpu.vector_store %arg4[%c0_5, %c0_6], %5 {strides = array<i32>} : memref<8x128xf32, #tpu.memory_space<vmem>>, vector<8x128xf32>,
    return
  }
  func.func @transform_0(%arg0: i32) -> (i32, i32) {
    %c0_i32 = arith.constant 0 : i32
    %c0_i32_0 = arith.constant 0 : i32
    return %arg0, %c0_i32 : i32, i32
  }
  func.func @transform_1(%arg0: i32) -> (i32, i32) {
    %c0_i32 = arith.constant 0 : i32
    %c0_i32_0 = arith.constant 0 : i32
    %c0_i32_1 = arith.constant 0 : i32
    return %c0_i32, %c0_i32_0 : i32, i32
  }
  func.func @transform_2(%arg0: i32) -> (i32, i32) {
    %c0_i32 = arith.constant 0 : i32
    %c0_i32_0 = arith.constant 0 : i32
    %c0_i32_1 = arith.constant 0 : i32
    return %c0_i32, %c0_i32_0 : i32, i32
  }
  func.func @transform_3(%arg0: i32) -> (i32, i32) {
    %c0_i32 = arith.constant 0 : i32
    %c0_i32_0 = arith.constant 0 : i32
    return %arg0, %c0_i32 : i32, i32
  }
}

</mosaic_0001>

<bundles_post_ra>
// kernel: flatten_head_shared.1
= control target key start
LH: loop header
LB: loop body
LE: loop exit
PB: predicated region body
PF: predicated region fallthrough
CT: control target
= control target key end

     0   :  { %s918_s0 = inlined_call_operand.vmem [shape: f32[8,768], index: 0, kind: input, shape index: {}]   ;;  %s919_s1 = inlined_call_operand.vmem [shape: f32[768,128], index: 1, kind: input, shape index: {}]   ;;  %s920_s2 = inlined_call_operand.vmem [shape: f32[1,128], index: 2, kind: input, shape index: {}]   ;;  %s921_s3 = inlined_call_operand.hbm [shape: f32[8,128], index: 3, kind: output, shape index: {}]  }
   0x1   :  { %v37_v0 = vld [vmem:[%s919_s1 + $0x80] sm:$0xff]  ;;  %v38_v1 = vld [vmem:[%s919_s1 + $0x88] sm:$0xff]  ;;  %v39_v11 = vld [vmem:[%s919_s1 + $0x90] sm:$0xff] }
   0x2   :  { %v21_v2 = vld [vmem:[%s919_s1] sm:$0xff]  ;;  %v455_v3 = vpack.c.bf16 %v38_v1, %v37_v0  ;;  %v22_v4 = vld [vmem:[%s919_s1 + $0x8] sm:$0xff]  ;;  %v40_v13 = vld [vmem:[%s919_s1 + $0x98] sm:$0xff] }
   0x3   :  { %v69_v5 = vld [vmem:[%s919_s1 + $0x180] sm:$0xff]  ;;  %v70_v6 = vld [vmem:[%s919_s1 + $0x188] sm:$0xff]  ;;  %v457_v7 = vpack.c.bf16 %v22_v4, %v21_v2  ;;  %v23_v14 = vld [vmem:[%s919_s1 + $0x10] sm:$0xff]  ;;  %v459_v16 = vpack.c.bf16 %v40_v13, %v39_v11 }
   0x4   :  { %v487_v8 = vpack.c.bf16 %v70_v6, %v69_v5  ;;  %v53_v9 = vld [vmem:[%s919_s1 + $0x100] sm:$0xff]  ;;  %v54_v10 = vld [vmem:[%s919_s1 + $0x108] sm:$0xff]  ;;  %456 = vmatprep.subr.bf16.mxu0 %v455_v3  ;;  %v24_v15 = vld [vmem:[%s919_s1 + $0x18] sm:$0xff] }
   0x5   :  { %v489_v12 = vpack.c.bf16 %v54_v10, %v53_v9  ;;  %458 = vmatpush3.bf16.msra.mxu0 %v457_v7  ;;  %v461_v17 = vpack.c.bf16 %v24_v15, %v23_v14  ;;  %v71_v18 = vld [vmem:[%s919_s1 + $0x190] sm:$0xff]  ;;  %v72_v19 = vld [vmem:[%s919_s1 + $0x198] sm:$0xff]  ;;  %v41_v23 = vld [vmem:[%s919_s1 + $0xa0] sm:$0xff] }
   0x6   :  { %488 = vmatprep.subr.bf16.mxu1 %v487_v8  ;;  %v55_v20 = vld [vmem:[%s919_s1 + $0x110] sm:$0xff]  ;;  %v491_v21 = vpack.c.bf16 %v72_v19, %v71_v18  ;;  %v56_v22 = vld [vmem:[%s919_s1 + $0x118] sm:$0xff]  ;;  %v42_v24 = vld [vmem:[%s919_s1 + $0xa8] sm:$0xff]  ;;  %460 = vmatprep.subr.bf16.mxu0 %v459_v16 }
   0x7   :  { %490 = vmatpush3.bf16.msra.mxu1 %v489_v12  ;;  %v493_v25 = vpack.c.bf16 %v56_v22, %v55_v20  ;;  %v463_v26 = vpack.c.bf16 %v42_v24, %v41_v23  ;;  %v25_v27 = vld [vmem:[%s919_s1 + $0x20] sm:$0xff]  ;;  %v26_v28 = vld [vmem:[%s919_s1 + $0x28] sm:$0xff]  ;;  %v43_v35 = vld [vmem:[%s919_s1 + $0xb0] sm:$0xff] }
   0x8   :  { %v73_v29 = vld [vmem:[%s919_s1 + $0x1a0] sm:$0xff]  ;;  %492 = vmatprep.subr.bf16.mxu1 %v491_v21  ;;  %v74_v30 = vld [vmem:[%s919_s1 + $0x1a8] sm:$0xff]  ;;  %v465_v33 = vpack.c.bf16 %v26_v28, %v25_v27  ;;  %v44_v36 = vld [vmem:[%s919_s1 + $0xb8] sm:$0xff] }
   0x9   :  { %v57_v31 = vld [vmem:[%s919_s1 + $0x120] sm:$0xff]  ;;  %v58_v32 = vld [vmem:[%s919_s1 + $0x128] sm:$0xff]  ;;  %462 = vmatpush3.bf16.msra.mxu0 %v461_v17  ;;  %v495_v34 = vpack.c.bf16 %v74_v30, %v73_v29  ;;  %v27_v37 = vld [vmem:[%s919_s1 + $0x30] sm:$0xff]  ;;  %v467_v39 = vpack.c.bf16 %v44_v36, %v43_v35 }
   0xa   :  { %464 = vmatprep.subr.bf16.mxu0 %v463_v26  ;;  %v497_v38 = vpack.c.bf16 %v58_v32, %v57_v31  ;;  %v28_v40 = vld [vmem:[%s919_s1 + $0x38] sm:$0xff]  ;;  %v75_v41 = vld [vmem:[%s919_s1 + $0x1b0] sm:$0xff]  ;;  %v45_v46 = vld [vmem:[%s919_s1 + $0xc0] sm:$0xff] }
   0xb   :  { %494 = vmatpush3.bf16.msra.mxu1 %v493_v25  ;;  %v76_v42 = vld [vmem:[%s919_s1 + $0x1b8] sm:$0xff]  ;;  %v59_v44 = vld [vmem:[%s919_s1 + $0x130] sm:$0xff]  ;;  %v46_v47 = vld [vmem:[%s919_s1 + $0xc8] sm:$0xff]  ;;  %v469_v48 = vpack.c.bf16 %v28_v40, %v27_v37 }
   0xc   :  { %496 = vmatprep.subr.bf16.mxu1 %v495_v34  ;;  %v499_v43 = vpack.c.bf16 %v76_v42, %v75_v41  ;;  %v60_v45 = vld [vmem:[%s919_s1 + $0x138] sm:$0xff]  ;;  %v77_v49 = vld [vmem:[%s919_s1 + $0x1c0] sm:$0xff]  ;;  %v78_v50 = vld [vmem:[%s919_s1 + $0x1c8] sm:$0xff]  ;;  %v471_v52 = vpack.c.bf16 %v46_v47, %v45_v46 }
   0xd   :  { %466 = vmatpush3.bf16.msra.mxu0 %v465_v33  ;;  %v501_v51 = vpack.c.bf16 %v60_v45, %v59_v44  ;;  %v29_v53 = vld [vmem:[%s919_s1 + $0x40] sm:$0xff]  ;;  %v30_v54 = vld [vmem:[%s919_s1 + $0x48] sm:$0xff]  ;;  %v503_v56 = vpack.c.bf16 %v78_v50, %v77_v49  ;;  %v47_v58 = vld [vmem:[%s919_s1 + $0xd0] sm:$0xff] }
   0xe   :  { %468 = vmatprep.subr.bf16.mxu0 %v467_v39  ;;  %v61_v55 = vld [vmem:[%s919_s1 + $0x140] sm:$0xff]  ;;  %v62_v57 = vld [vmem:[%s919_s1 + $0x148] sm:$0xff]  ;;  %v48_v59 = vld [vmem:[%s919_s1 + $0xd8] sm:$0xff]  ;;  %v473_v62 = vpack.c.bf16 %v30_v54, %v29_v53 }
   0xf   :  { %498 = vmatpush3.bf16.msra.mxu1 %v497_v38  ;;  %v79_v60 = vld [vmem:[%s919_s1 + $0x1d0] sm:$0xff]  ;;  %v80_v61 = vld [vmem:[%s919_s1 + $0x1d8] sm:$0xff]  ;;  %v505_v63 = vpack.c.bf16 %v62_v57, %v61_v55  ;;  %v475_v0 = vpack.c.bf16 %v48_v59, %v47_v58  ;;  %v49_v6 = vld [vmem:[%s919_s1 + $0xe0] sm:$0xff] }
  0x10   :  { %500 = vmatprep.subr.bf16.mxu1 %v499_v43  ;;  %v31_v1 = vld [vmem:[%s919_s1 + $0x50] sm:$0xff]  ;;  %v32_v2 = vld [vmem:[%s919_s1 + $0x58] sm:$0xff]  ;;  %v507_v4 = vpack.c.bf16 %v80_v61, %v79_v60  ;;  %v50_v7 = vld [vmem:[%s919_s1 + $0xe8] sm:$0xff] }
  0x11   :  { %470 = vmatpush3.bf16.msra.mxu0 %v469_v48  ;;  %v63_v3 = vld [vmem:[%s919_s1 + $0x150] sm:$0xff]  ;;  %v64_v5 = vld [vmem:[%s919_s1 + $0x158] sm:$0xff]  ;;  %v81_v8 = vld [vmem:[%s919_s1 + $0x1e0] sm:$0xff]  ;;  %v477_v10 = vpack.c.bf16 %v32_v2, %v31_v1  ;;  %v479_v14 = vpack.c.bf16 %v50_v7, %v49_v6 }
  0x12   :  { %472 = vmatprep.subr.bf16.mxu0 %v471_v52  ;;  %v82_v9 = vld [vmem:[%s919_s1 + $0x1e8] sm:$0xff]  ;;  %v33_v11 = vld [vmem:[%s919_s1 + $0x60] sm:$0xff]  ;;  %v509_v13 = vpack.c.bf16 %v64_v5, %v63_v3  ;;  %v51_v19 = vld [vmem:[%s919_s1 + $0xf0] sm:$0xff] }
  0x13   :  { %502 = vmatpush3.bf16.msra.mxu1 %v501_v51  ;;  %v16_v12 = vld [vmem:[%s918_s0 + $0x8] sm:$0xff]  ;;  %v65_v16 = vld [vmem:[%s919_s1 + $0x160] sm:$0xff]  ;;  %v511_v18 = vpack.c.bf16 %v82_v9, %v81_v8  ;;  %v52_v20 = vld [vmem:[%s919_s1 + $0xf8] sm:$0xff] }
  0x14   :  { %504 = vmatprep.subr.bf16.mxu1 %v503_v56  ;;  %v34_v15 = vld [vmem:[%s919_s1 + $0x68] sm:$0xff]  ;;  %188 = vmatprep.mubr.f32.mxu0 %v16_v12  ;;  %v18_v21 = vld [vmem:[%s918_s0 + $0x18] sm:$0xff]  ;;  %v83_v22 = vld [vmem:[%s919_s1 + $0x1f0] sm:$0xff]  ;;  %v483_v26 = vpack.c.bf16 %v52_v20, %v51_v19 }
  0x15   :  { %474 = vmatpush3.bf16.msra.mxu0 %v473_v62  ;;  %v66_v17 = vld [vmem:[%s919_s1 + $0x168] sm:$0xff]  ;;  %v84_v23 = vld [vmem:[%s919_s1 + $0x1f8] sm:$0xff]  ;;  %258 = vmatprep.mubr.f32.mxu1 %v18_v21  ;;  %v481_v24 = vpack.c.bf16 %v34_v15, %v33_v11  ;;  %v35_v27 = vld [vmem:[%s919_s1 + $0x70] sm:$0xff] }
  0x16   :  { %476 = vmatprep.subr.bf16.mxu0 %v475_v0  ;;  %v513_v25 = vpack.c.bf16 %v66_v17, %v65_v16  ;;  %v36_v28 = vld [vmem:[%s919_s1 + $0x78] sm:$0xff]  ;;  %v67_v29 = vld [vmem:[%s919_s1 + $0x170] sm:$0xff]  ;;  %v515_v30 = vpack.c.bf16 %v84_v23, %v83_v22  ;;  %v101_v32 = vld [vmem:[%s919_s1 + $0x280] sm:$0xff] }
  0x17   :  { %506 = vmatpush3.bf16.msra.mxu1 %v505_v63  ;;  %v68_v31 = vld [vmem:[%s919_s1 + $0x178] sm:$0xff]  ;;  %v102_v33 = vld [vmem:[%s919_s1 + $0x288] sm:$0xff]  ;;  %v485_v34 = vpack.c.bf16 %v36_v28, %v35_v27  ;;  %v85_v37 = vld [vmem:[%s919_s1 + $0x200] sm:$0xff] }
  0x18   :  { %508 = vmatprep.subr.bf16.mxu1 %v507_v4  ;;  %v517_v35 = vpack.c.bf16 %v68_v31, %v67_v29  ;;  %v519_v36 = vpack.c.bf16 %v102_v33, %v101_v32  ;;  %v86_v38 = vld [vmem:[%s919_s1 + $0x208] sm:$0xff]  ;;  %v103_v39 = vld [vmem:[%s919_s1 + $0x290] sm:$0xff]  ;;  %v104_v40 = vld [vmem:[%s919_s1 + $0x298] sm:$0xff] }
  0x19   :  { %478 = vmatpush3.bf16.msra.mxu0 %v477_v10  ;;  %v15_v41 = vld [vmem:[%s918_s0] sm:$0xff]  ;;  %v521_v42 = vpack.c.bf16 %v86_v38, %v85_v37  ;;  %v17_v43 = vld [vmem:[%s918_s0 + $0x10] sm:$0xff]  ;;  %v523_v44 = vpack.c.bf16 %v104_v40, %v103_v39  ;;  %v88_v46 = vld [vmem:[%s919_s1 + $0x218] sm:$0xff] }
  0x1a   :  { %480 = vmatprep.subr.bf16.mxu0 %v479_v14  ;;  %v87_v45 = vld [vmem:[%s919_s1 + $0x210] sm:$0xff]  ;;  %v105_v47 = vld [vmem:[%s919_s1 + $0x2a0] sm:$0xff]  ;;  %v106_v48 = vld [vmem:[%s919_s1 + $0x2a8] sm:$0xff] }
  0x1b   :  { %510 = vmatpush3.bf16.msra.mxu1 %v509_v13  ;;  %v20_v49 = vld [vmem:[%s918_s0 + $0x28] sm:$0xff] }
  0x1c   :  { %512 = vmatprep.subr.bf16.mxu1 %v511_v18 }
  0x1d   :  { %482 = vmatpush3.bf16.msra.mxu0 %v481_v24 }
  0x1e   :  { %484 = vmatprep.subr.bf16.mxu0 %v483_v26 }
  0x1f   :  { %514 = vmatpush3.bf16.msra.mxu1 %v513_v25 }
  0x20   :  { %516 = vmatprep.subr.bf16.mxu1 %v515_v30 }
  0x21   :  { %486 = vmatpush3.bf16.msra.mxu0 %v485_v34 }
  0x22   :  { %520 = vmatprep.subr.bf16.mxu0 %v519_v36 }
  0x23   :  { %518 = vmatpush3.bf16.msra.mxu1 %v517_v35 }
  0x24   :  { %8 = vsyncpa [#allocation3], 0  ;;  %189 = vmatmul.mubr.f32.vlgmr.msra.gmra.mrb[0].mxu0 %v15_v41  ;;  %v525_v50 = vpack.c.bf16 %v88_v46, %v87_v45  ;;  %v527_v51 = vpack.c.bf16 %v106_v48, %v105_v47  ;;  %v89_v52 = vld [vmem:[%s919_s1 + $0x220] sm:$0xff]  ;;  %v90_v53 = vld [vmem:[%s919_s1 + $0x228] sm:$0xff] }
  0x25   :  { %522 = vmatpush3.bf16.msra.mxu0 %v521_v42  ;;  %328 = vmatprep.mubr.f32.mxu0 %v20_v49  ;;  %v107_v54 = vld [vmem:[%s919_s1 + $0x2b0] sm:$0xff]  ;;  %v108_v55 = vld [vmem:[%s919_s1 + $0x2b8] sm:$0xff]  ;;  %v529_v56 = vpack.c.bf16 %v90_v53, %v89_v52  ;;  %v109_v60 = vld [vmem:[%s919_s1 + $0x2c0] sm:$0xff] }
  0x26   :  { %259 = vmatmul.mubr.f32.vlgmr.msra.gmra.mrb[0].mxu1 %v17_v43  ;;  %524 = vmatprep.subr.bf16.mxu0 %v523_v44  ;;  %v531_v57 = vpack.c.bf16 %v108_v55, %v107_v54  ;;  %v91_v58 = vld [vmem:[%s919_s1 + $0x230] sm:$0xff]  ;;  %v92_v59 = vld [vmem:[%s919_s1 + $0x238] sm:$0xff]  ;;  %v110_v61 = vld [vmem:[%s919_s1 + $0x2c8] sm:$0xff] }
  0x27   :  { %v533_v62 = vpack.c.bf16 %v92_v59, %v91_v58  ;;  %v535_v63 = vpack.c.bf16 %v110_v61, %v109_v60  ;;  %v93_v0 = vld [vmem:[%s919_s1 + $0x240] sm:$0xff]  ;;  %v94_v1 = vld [vmem:[%s919_s1 + $0x248] sm:$0xff]  ;;  %v111_v2 = vld [vmem:[%s919_s1 + $0x2d0] sm:$0xff] }
  0x28   :  { %v112_v3 = vld [vmem:[%s919_s1 + $0x2d8] sm:$0xff]  ;;  %v537_v4 = vpack.c.bf16 %v94_v1, %v93_v0  ;;  %v95_v6 = vld [vmem:[%s919_s1 + $0x250] sm:$0xff]  ;;  %v113_v8 = vld [vmem:[%s919_s1 + $0x2e0] sm:$0xff] }
  0x29   :  { %526 = vmatpush3.bf16.msra.mxu0 %v525_v50  ;;  %v539_v5 = vpack.c.bf16 %v112_v3, %v111_v2  ;;  %v96_v7 = vld [vmem:[%s919_s1 + $0x258] sm:$0xff]  ;;  %v114_v9 = vld [vmem:[%s919_s1 + $0x2e8] sm:$0xff]  ;;  %v97_v12 = vld [vmem:[%s919_s1 + $0x260] sm:$0xff] }
  0x2a   :  { %528 = vmatprep.subr.bf16.mxu0 %v527_v51  ;;  %v541_v10 = vpack.c.bf16 %v96_v7, %v95_v6  ;;  %v543_v11 = vpack.c.bf16 %v114_v9, %v113_v8  ;;  %v98_v13 = vld [vmem:[%s919_s1 + $0x268] sm:$0xff]  ;;  %v115_v14 = vld [vmem:[%s919_s1 + $0x2f0] sm:$0xff]  ;;  %v116_v15 = vld [vmem:[%s919_s1 + $0x2f8] sm:$0xff] }
  0x2b   :  { %v545_v16 = vpack.c.bf16 %v98_v13, %v97_v12  ;;  %v547_v17 = vpack.c.bf16 %v116_v15, %v115_v14  ;;  %v99_v18 = vld [vmem:[%s919_s1 + $0x270] sm:$0xff]  ;;  %v100_v19 = vld [vmem:[%s919_s1 + $0x278] sm:$0xff]  ;;  %v19_v21 = vld [vmem:[%s918_s0 + $0x20] sm:$0xff]  ;;  %s576_s1 = smov [#allocation2]  }
  0x2c   :  { %v549_v20 = vpack.c.bf16 %v100_v19, %v99_v18  ;;  %v349_v23 = vld [vmem:[%s920_s2] ss:$0 sm:$0xff]  ;;  %s341_s29 = sshll.u32 %s576_s1, 4  ;;  %s342_s29 = int_to_ptr.vmem [resolvable:$true] %s341_s29 }
  0x2d   :  { %530 = vmatpush3.bf16.msra.mxu0 %v529_v56  ;;  %s552_s0 = scalar_lea.vmem %s342_s29, 128  ;;  %p557_p1 = scmp.lt.s32.totalorder %s342_s29, %s342_s29 }
  0x2e   :  { %532 = vmatprep.subr.bf16.mxu0 %v531_v57  ;;  %p553_p0 = scmp.ne.s32.totalorder %s342_s29, %s552_s0  ;;  %p558_p2 = scmp.lt.s32.totalorder %s552_s0, %s552_s0 }
  0x30   :  { %p559_p3 = por %p558_p2, %p557_p1 }
  0x31   :  { %534 = vmatpush3.bf16.msra.mxu0 %v533_v62 }
  0x32   :  { %536 = vmatprep.subr.bf16.mxu0 %v535_v63  ;;  %p560_p4 = pnand %p559_p3, %p553_p0 }
  0x35   :  { %538 = vmatpush3.bf16.msra.mxu0 %v537_v4 }
  0x36   :  { %540 = vmatprep.subr.bf16.mxu0 %v539_v5 }
  0x39   :  { %542 = vmatpush3.bf16.msra.mxu0 %v541_v10 }
  0x3a   :  { %544 = vmatprep.subr.bf16.mxu0 %v543_v11 }
  0x3d   :  { %546 = vmatpush3.bf16.msra.mxu0 %v545_v16 }
  0x3e   :  { %548 = vmatprep.subr.bf16.mxu0 %v547_v17 }
  0x41   :  { %550 = vmatpush3.bf16.msra.mxu0 %v549_v20 }
  0x44   :  { %329 = vmatmul.mubr.f32.vlgmr.msra.gmra.mrb[2].mxu0 %v19_v21 }
  0xf7   :  { %v382_v22 = vpop.f32.mrb[0].mxu0 }
  0xf8   :  { %v383_v24 = vpop.f32.mrb[1].mxu0 }
  0xf9   :  { %v417_v25 = vpop.f32.mrb[0].mxu1  ;;  %v384_v26 = vadd.f32 %v383_v24, %v382_v22 }
  0xfa   :  { %v418_v27 = vpop.f32.mrb[1].mxu1 }
  0xfb   :  { %v419_v28 = vadd.f32 %v418_v27, %v417_v25  ;;  %v191_v29 = vadd.f32 %v384_v26, %v349_v23 }
  0xfd   :  { %v261_v30 = vadd.f32 %v419_v28, %v191_v29 }
 0x117   :  { %v452_v31 = vpop.f32.mrb[2].mxu0 }
 0x118   :  { %v453_v32 = vpop.f32.mrb[3].mxu0 }
 0x119   :  { %v454_v33 = vadd.f32 %v453_v32, %v452_v31 }
 0x11b   :  { %v331_v34 = vadd.f32 %v454_v33, %v261_v30 }
 0x11d   :  { %334 = vst [vmem:[#allocation2] sm:$0xff] %v331_v34 }
 0x11e   :  { %563 = shalt.err (!%p560_p4)
}
 0x11f   :  { %s564_s4 = scalar_lea.hbm %s921_s3, 128 }
 0x120   :  { %p565_p5 = scmp.ne.s32.totalorder %s921_s3, %s564_s4  ;;  %p568_p6 = scmp.lt.u32.totalorder %s564_s4, %s921_s3 }
 0x122   :  { %p570_p7 = pnand %p568_p6, %p565_p5 }
 0x124   :  { %573 = shalt.err (!%p570_p7)
}
 0x125   :  { %344 = dma.vmem_to_hbm [thread:$0]  %s342_s29, 128, %s921_s3, [#allocation3]  }
 0x126   :  { %574 = dma.done.wait [#allocation3], 128  }
 0x127   :  { %575 = vsyncadd [#allocation3], 4294967168 }
 0x128   :  { %348 = vsyncpa [#allocation3], 1 }

</bundles_post_ra>
